<compile_context>
chip_gen: v7x
topology: tpu7x:2x2x1
jax: 0.10.0
libtpu: 0.0.40
codegen_flags: <defaults>
</compile_context>

<pallas_src>
import math
import jax
import jax.numpy as jnp
from jax.experimental import pallas as pl
from jax.experimental.pallas import tpu as pltpu

B, S, D = 2, 8, 32      # batch, seq len, model dim
H = 4                   # attention heads
DK = D // H             # head dim
DFF = 64                # feed-forward hidden dim
EPS = 1e-6


def _layernorm(x, a, b):
    # torch.std(-1, keepdim=True) is the unbiased (ddof=1) estimator.
    mean = jnp.mean(x, axis=-1, keepdims=True)
    var = jnp.sum((x - mean) ** 2, axis=-1, keepdims=True) * (1.0 / (x.shape[-1] - 1))
    # rsqrt lowers to the EUP (its own VLIW slot) instead of a VPU divide chain.
    return a * ((x - mean) * jax.lax.rsqrt(var + EPS)) + b


def encoder_layer_kernel(x_ref, mask_ref,
                         ln1_a_ref, ln1_b_ref,
                         wqkv_ref, bqkv_ref,
                         wo_ref, bo_ref,
                         ln2_a_ref, ln2_b_ref,
                         w1_ref, b1_ref, w2_ref, b2_ref,
                         out_ref):
    x = x_ref[0]                                   # (S, D)

    # Hoisted additive mask bias, computed ONCE (not per head):
    # mask==1 -> 0.0, mask==0 -> -1e9.  Broadcasts over query rows.
    mask_bias = (mask_ref[0] - 1.0) * 1e9          # (1, S)

    # ---- sublayer 0: x + SelfAttn(LayerNorm(x)) ----
    y = _layernorm(x, ln1_a_ref[...], ln1_b_ref[...])

    # Fused QKV projection: one (S,D)@(D,3D) MXU op instead of three (S,D)@(D,D).
    qkv = jnp.dot(y, wqkv_ref[...], preferred_element_type=jnp.float32) + bqkv_ref[...]

    scale = 1.0 / math.sqrt(DK)
    ctx_heads = []
    for h in range(H):                             # statically unrolled, H = 4
        qh = qkv[:, h * DK:(h + 1) * DK]                   # (S, DK)
        kh = qkv[:, D + h * DK:D + (h + 1) * DK]           # (S, DK)
        vh = qkv[:, 2 * D + h * DK:2 * D + (h + 1) * DK]   # (S, DK)
        scores = jnp.dot(qh, kh.T, preferred_element_type=jnp.float32) * scale
        scores = scores + mask_bias                        # one VPU add per head
        scores = scores - jnp.max(scores, axis=-1, keepdims=True)
        p = jnp.exp(scores)
        # Softmax denominator via approximate EUP reciprocal (otherwise-idle slot).
        p = p * pl.reciprocal(jnp.sum(p, axis=-1, keepdims=True), approx=True)
        ctx_heads.append(jnp.dot(p, vh, preferred_element_type=jnp.float32))

    # Concatenate heads once, then a SINGLE (S,D)@(D,D) output projection.
    ctx = jnp.concatenate(ctx_heads, axis=1)               # (S, D)
    attn = jnp.dot(ctx, wo_ref[...], preferred_element_type=jnp.float32) + bo_ref[...]

    x1 = x + attn        # dropout == identity (eval mode)

    # ---- sublayer 1: x1 + FFN(LayerNorm(x1)) ----
    y2 = _layernorm(x1, ln2_a_ref[...], ln2_b_ref[...])
    h1 = jnp.maximum(
        jnp.dot(y2, w1_ref[...], preferred_element_type=jnp.float32) + b1_ref[...],
        0.0)
    ff = jnp.dot(h1, w2_ref[...], preferred_element_type=jnp.float32) + b2_ref[...]

    # Note: last dim is 32 (<128 lanes) so this is a masked store; making it
    # lane-dense (B, S*D) would require an in-kernel sublane->lane relayout that
    # costs more than the ~1 KiB of writeback it saves at this size.
    out_ref[0] = x1 + ff


def encoder_layer(x, mask, params):
    """x: (B,S,D) f32, mask: (B,1,S) f32 (1 = attend, 0 = masked).

    `params` is the module-faithful 16-tensor list; Q/K/V weights and biases are
    fused into one (D,3D)/(1,3D) pair here in the wrapper so the kernel issues a
    single QKV matmul.
    """
    (ln1_a, ln1_b, wq, bq, wk, bk, wv, bv, wo, bo,
     ln2_a, ln2_b, w1, b1, w2, b2) = params
    wqkv = jnp.concatenate([wq, wk, wv], axis=1)   # (D, 3D)
    bqkv = jnp.concatenate([bq, bk, bv], axis=1)   # (1, 3D)
    fused = [ln1_a, ln1_b, wqkv, bqkv, wo, bo, ln2_a, ln2_b, w1, b1, w2, b2]

    in_specs = [
        pl.BlockSpec((1, S, D), lambda b: (b, 0, 0)),
        pl.BlockSpec((1, 1, S), lambda b: (b, 0, 0)),
        # Weights: full-array blocks with constant index maps -> the pipeliner
        # keeps them resident in VMEM across grid steps (no re-issued DMAs).
    ] + [pl.BlockSpec(p.shape, lambda b: (0, 0)) for p in fused]

    return pl.pallas_call(
        encoder_layer_kernel,
        out_shape=jax.ShapeDtypeStruct((B, S, D), jnp.float32),
        grid_spec=pltpu.PrefetchScalarGridSpec(
            num_scalar_prefetch=0,
            grid=(B,),
            in_specs=in_specs,
            out_specs=pl.BlockSpec((1, S, D), lambda b: (b, 0, 0)),
        ),
        # Batch axis stays "parallel": v7x's two TensorCores each take one batch
        # element; on single-TC v5e/v6e the second step adds only ~0.35 us.
        compiler_params=pltpu.CompilerParams(dimension_semantics=("parallel",)),
    )(x, mask, *fused)


def reference(x, mask, params):
    (ln1_a, ln1_b, wq, bq, wk, bk, wv, bv, wo, bo,
     ln2_a, ln2_b, w1, b1, w2, b2) = params

    def ln(x, a, b):
        mean = jnp.mean(x, axis=-1, keepdims=True)
        var = jnp.sum((x - mean) ** 2, axis=-1, keepdims=True) / (x.shape[-1] - 1)
        return a * (x - mean) / jnp.sqrt(var + EPS) + b

    y = ln(x, ln1_a, ln1_b)
    q = y @ wq + bq
    k = y @ wk + bk
    v = y @ wv + bv
    qh = q.reshape(B, S, H, DK).transpose(0, 2, 1, 3)
    kh = k.reshape(B, S, H, DK).transpose(0, 2, 1, 3)
    vh = v.reshape(B, S, H, DK).transpose(0, 2, 1, 3)
    sc = jnp.einsum("bhqd,bhkd->bhqk", qh, kh) / math.sqrt(DK)
    sc = jnp.where(mask[:, None, :, :] == 0, -1e9, sc)
    p = jax.nn.softmax(sc, axis=-1)
    ctx = jnp.einsum("bhqk,bhkd->bhqd", p, vh).transpose(0, 2, 1, 3).reshape(B, S, D)
    x1 = x + (ctx @ wo + bo)
    y2 = ln(x1, ln2_a, ln2_b)
    return x1 + (jnp.maximum(y2 @ w1 + b1, 0.0) @ w2 + b2)


if __name__ == "__main__":
    key = jax.random.PRNGKey(0)
    keys = jax.random.split(key, 10)

    x = jax.random.normal(keys[0], (B, S, D), jnp.float32)
    # mask: batch 0 attends everywhere; batch 1 masks the last two key positions.
    mask = jnp.ones((B, 1, S), jnp.float32)
    mask = mask.at[1, 0, S - 2:].set(0.0)

    def w(k, shape, scale=0.1):
        return (scale * jax.random.normal(k, shape)).astype(jnp.float32)

    params = [
        jnp.ones((1, D), jnp.float32),               # ln1 a_2
        jnp.zeros((1, D), jnp.float32),              # ln1 b_2
        w(keys[1], (D, D)), jnp.zeros((1, D), jnp.float32),      # Wq, bq
        w(keys[2], (D, D)), jnp.zeros((1, D), jnp.float32),      # Wk, bk
        w(keys[3], (D, D)), jnp.zeros((1, D), jnp.float32),      # Wv, bv
        w(keys[4], (D, D)), jnp.zeros((1, D), jnp.float32),      # Wo, bo
        jnp.ones((1, D), jnp.float32),               # ln2 a_2
        jnp.zeros((1, D), jnp.float32),              # ln2 b_2
        w(keys[5], (D, DFF)), jnp.zeros((1, DFF), jnp.float32),  # W1, b1
        w(keys[6], (DFF, D)), jnp.zeros((1, D), jnp.float32),    # W2, b2
    ]

    out = encoder_layer(x, mask, params)
    jax.block_until_ready(out)

    ref = reference(x, mask, params)
    # Tolerance is 2e-3 (not 1e-4) solely because the kernel uses the
    # approximate EUP reciprocal for the softmax denominator; any semantic bug
    # (mask, LN variance, head split, ...) would produce O(0.1-1) errors.
    assert jnp.allclose(out, ref, rtol=2e-3, atol=2e-3), "mismatch vs JAX reference"

    print("KERNEL_OK")
</pallas_src>

<mosaic_0001>
module attributes {stable_mosaic.version = 11 : i64} {
  func.func @encoder_layer_kernel(%arg0: i32, %arg1: memref<1x8x32xf32, #tpu.memory_space<vmem>>, %arg2: memref<1x1x8xf32, #tpu.memory_space<vmem>>, %arg3: memref<1x32xf32, #tpu.memory_space<vmem>>, %arg4: memref<1x32xf32, #tpu.memory_space<vmem>>, %arg5: memref<32x96xf32, #tpu.memory_space<vmem>>, %arg6: memref<1x96xf32, #tpu.memory_space<vmem>>, %arg7: memref<32x32xf32, #tpu.memory_space<vmem>>, %arg8: memref<1x32xf32, #tpu.memory_space<vmem>>, %arg9: memref<1x32xf32, #tpu.memory_space<vmem>>, %arg10: memref<1x32xf32, #tpu.memory_space<vmem>>, %arg11: memref<32x64xf32, #tpu.memory_space<vmem>>, %arg12: memref<1x64xf32, #tpu.memory_space<vmem>>, %arg13: memref<64x32xf32, #tpu.memory_space<vmem>>, %arg14: memref<1x32xf32, #tpu.memory_space<vmem>>, %arg15: memref<1x8x32xf32, #tpu.memory_space<vmem>>) attributes {dimension_semantics = [#tpu.dimension_semantics<parallel>], iteration_bounds = array<i64: 2>, scalar_prefetch = 0 : i64, scratch_operands = 0 : i64, tpu.core_type = #tpu.core_type<tc>, window_params = [{transform_indices = @transform_0, window_bounds = array<i64: 1, 8, 32>}, {transform_indices = @transform_1, window_bounds = array<i64: 1, 1, 8>}, {pipeline_mode = #tpu.pipeline_mode<synchronous>, transform_indices = @transform_2, window_bounds = array<i64: 1, 32>}, {pipeline_mode = #tpu.pipeline_mode<synchronous>, transform_indices = @transform_3, window_bounds = array<i64: 1, 32>}, {pipeline_mode = #tpu.pipeline_mode<synchronous>, transform_indices = @transform_4, window_bounds = array<i64: 32, 96>}, {pipeline_mode = #tpu.pipeline_mode<synchronous>, transform_indices = @transform_5, window_bounds = array<i64: 1, 96>}, {pipeline_mode = #tpu.pipeline_mode<synchronous>, transform_indices = @transform_6, window_bounds = array<i64: 32, 32>}, {pipeline_mode = #tpu.pipeline_mode<synchronous>, transform_indices = @transform_7, window_bounds = array<i64: 1, 32>}, {pipeline_mode = #tpu.pipeline_mode<synchronous>, transform_indices = @transform_8, window_bounds = array<i64: 1, 32>}, {pipeline_mode = #tpu.pipeline_mode<synchronous>, transform_indices = @transform_9, window_bounds = array<i64: 1, 32>}, {pipeline_mode = #tpu.pipeline_mode<synchronous>, transform_indices = @transform_10, window_bounds = array<i64: 32, 64>}, {pipeline_mode = #tpu.pipeline_mode<synchronous>, transform_indices = @transform_11, window_bounds = array<i64: 1, 64>}, {pipeline_mode = #tpu.pipeline_mode<synchronous>, transform_indices = @transform_12, window_bounds = array<i64: 64, 32>}, {pipeline_mode = #tpu.pipeline_mode<synchronous>, transform_indices = @transform_13, window_bounds = array<i64: 1, 32>}, {transform_indices = @transform_14, window_bounds = array<i64: 1, 8, 32>}]} {
    %c0 = arith.constant 0 : index
    %c0_0 = arith.constant 0 : index
    %c0_1 = arith.constant 0 : index
    %0 = vector.load %arg1[%c0, %c0_0, %c0_1] : memref<1x8x32xf32, #tpu.memory_space<vmem>>, vector<1x8x32xf32>
    %1 = vector.shape_cast %0 : vector<1x8x32xf32> to vector<8x32xf32>
    %c0_2 = arith.constant 0 : index
    %c0_3 = arith.constant 0 : index
    %c0_4 = arith.constant 0 : index
    %2 = vector.load %arg2[%c0_2, %c0_3, %c0_4] : memref<1x1x8xf32, #tpu.memory_space<vmem>>, vector<1x1x8xf32>
    %3 = vector.shape_cast %2 : vector<1x1x8xf32> to vector<1x8xf32>
    %cst = arith.constant 1.000000e+00 : f32
    %4 = vector.broadcast %cst : f32 to vector<1x8xf32>
    %5 = arith.subf %3, %4 : vector<1x8xf32>
    %cst_5 = arith.constant 1.000000e+09 : f32
    %6 = vector.broadcast %cst_5 : f32 to vector<1x8xf32>
    %7 = arith.mulf %5, %6 : vector<1x8xf32>
    %c0_6 = arith.constant 0 : index
    %c0_7 = arith.constant 0 : index
    %8 = vector.load %arg3[%c0_6, %c0_7] : memref<1x32xf32, #tpu.memory_space<vmem>>, vector<1x32xf32>
    %c0_8 = arith.constant 0 : index
    %c0_9 = arith.constant 0 : index
    %9 = vector.load %arg4[%c0_8, %c0_9] : memref<1x32xf32, #tpu.memory_space<vmem>>, vector<1x32xf32>
    %cst_10 = arith.constant dense<0.000000e+00> : vector<8xf32>
    %10 = vector.multi_reduction <add>, %1, %cst_10 [1] : vector<8x32xf32> to vector<8xf32>
    %11 = vector.shape_cast %10 : vector<8xf32> to vector<8x1xf32>
    %cst_11 = arith.constant 3.200000e+01 : f32
    %12 = vector.broadcast %cst_11 : f32 to vector<8x1xf32>
    %13 = arith.divf %11, %12 : vector<8x1xf32>
    %14 = vector.broadcast %13 : vector<8x1xf32> to vector<8x32xf32>
    %15 = arith.subf %1, %14 : vector<8x32xf32>
    %16 = arith.mulf %15, %15 : vector<8x32xf32>
    %cst_12 = arith.constant dense<0.000000e+00> : vector<8xf32>
    %17 = vector.multi_reduction <add>, %16, %cst_12 [1] : vector<8x32xf32> to vector<8xf32>
    %18 = vector.shape_cast %17 : vector<8xf32> to vector<8x1xf32>
    %cst_13 = arith.constant 0.0322580636 : f32
    %19 = vector.broadcast %cst_13 : f32 to vector<8x1xf32>
    %20 = arith.mulf %18, %19 : vector<8x1xf32>
    %21 = vector.broadcast %13 : vector<8x1xf32> to vector<8x32xf32>
    %22 = arith.subf %1, %21 : vector<8x32xf32>
    %cst_14 = arith.constant 9.99999997E-7 : f32
    %23 = vector.broadcast %cst_14 : f32 to vector<8x1xf32>
    %24 = arith.addf %20, %23 : vector<8x1xf32>
    %25 = math.rsqrt %24 : vector<8x1xf32>
    %26 = vector.broadcast %25 : vector<8x1xf32> to vector<8x32xf32>
    %27 = arith.mulf %22, %26 : vector<8x32xf32>
    %28 = vector.broadcast %8 : vector<1x32xf32> to vector<8x32xf32>
    %29 = arith.mulf %28, %27 : vector<8x32xf32>
    %30 = vector.broadcast %9 : vector<1x32xf32> to vector<8x32xf32>
    %31 = arith.addf %29, %30 : vector<8x32xf32>
    %c0_15 = arith.constant 0 : index
    %c0_16 = arith.constant 0 : index
    %32 = vector.load %arg5[%c0_15, %c0_16] : memref<32x96xf32, #tpu.memory_space<vmem>>, vector<32x96xf32>
    %cst_17 = arith.constant dense<0.000000e+00> : vector<8x96xf32>
    %33 = tpu.matmul %31, %32, %cst_17 {dimension_numbers = #tpu.dot_dimension_numbers<[1], [0], [0], [1], [0, 0, 1, 1], [], []>} : vector<8x32xf32>, vector<32x96xf32>, vector<8x96xf32> -> vector<8x96xf32>
    %c0_18 = arith.constant 0 : index
    %c0_19 = arith.constant 0 : index
    %34 = vector.load %arg6[%c0_18, %c0_19] : memref<1x96xf32, #tpu.memory_space<vmem>>, vector<1x96xf32>
    %35 = vector.broadcast %34 : vector<1x96xf32> to vector<8x96xf32>
    %36 = arith.addf %33, %35 : vector<8x96xf32>
    %37 = vector.extract_strided_slice %36 {offsets = [0, 0], sizes = [8, 8], strides = [1, 1]} : vector<8x96xf32> to vector<8x8xf32>
    %38 = vector.extract_strided_slice %36 {offsets = [0, 32], sizes = [8, 8], strides = [1, 1]} : vector<8x96xf32> to vector<8x8xf32>
    %39 = vector.extract_strided_slice %36 {offsets = [0, 64], sizes = [8, 8], strides = [1, 1]} : vector<8x96xf32> to vector<8x8xf32>
    %40 = tpu.transpose %38, [1, 0] : vector<8x8xf32> -> vector<8x8xf32>
    %cst_20 = arith.constant dense<0.000000e+00> : vector<8x8xf32>
    %41 = tpu.matmul %37, %40, %cst_20 {dimension_numbers = #tpu.dot_dimension_numbers<[1], [0], [0], [1], [0, 0, 1, 1], [], []>} : vector<8x8xf32>, vector<8x8xf32>, vector<8x8xf32> -> vector<8x8xf32>
    %cst_21 = arith.constant 0.353553385 : f32
    %42 = vector.broadcast %cst_21 : f32 to vector<8x8xf32>
    %43 = arith.mulf %41, %42 : vector<8x8xf32>
    %44 = vector.broadcast %7 : vector<1x8xf32> to vector<8x8xf32>
    %45 = arith.addf %43, %44 : vector<8x8xf32>
    %cst_22 = arith.constant dense<0xFF800000> : vector<8xf32>
    %46 = vector.multi_reduction <maximumf>, %45, %cst_22 [1] : vector<8x8xf32> to vector<8xf32>
    %47 = vector.shape_cast %46 : vector<8xf32> to vector<8x1xf32>
    %48 = vector.broadcast %47 : vector<8x1xf32> to vector<8x8xf32>
    %49 = arith.subf %45, %48 : vector<8x8xf32>
    %50 = math.exp %49 : vector<8x8xf32>
    %cst_23 = arith.constant dense<0.000000e+00> : vector<8xf32>
    %51 = vector.multi_reduction <add>, %50, %cst_23 [1] : vector<8x8xf32> to vector<8xf32>
    %52 = vector.shape_cast %51 : vector<8xf32> to vector<8x1xf32>
    %53 = tpu.reciprocal %52 {approx = true} : vector<8x1xf32> -> vector<8x1xf32>
    %54 = vector.broadcast %53 : vector<8x1xf32> to vector<8x8xf32>
    %55 = arith.mulf %50, %54 : vector<8x8xf32>
    %cst_24 = arith.constant dense<0.000000e+00> : vector<8x8xf32>
    %56 = tpu.matmul %55, %39, %cst_24 {dimension_numbers = #tpu.dot_dimension_numbers<[1], [0], [0], [1], [0, 0, 1, 1], [], []>} : vector<8x8xf32>, vector<8x8xf32>, vector<8x8xf32> -> vector<8x8xf32>
    %57 = vector.extract_strided_slice %36 {offsets = [0, 8], sizes = [8, 8], strides = [1, 1]} : vector<8x96xf32> to vector<8x8xf32>
    %58 = vector.extract_strided_slice %36 {offsets = [0, 40], sizes = [8, 8], strides = [1, 1]} : vector<8x96xf32> to vector<8x8xf32>
    %59 = vector.extract_strided_slice %36 {offsets = [0, 72], sizes = [8, 8], strides = [1, 1]} : vector<8x96xf32> to vector<8x8xf32>
    %60 = tpu.transpose %58, [1, 0] : vector<8x8xf32> -> vector<8x8xf32>
    %cst_25 = arith.constant dense<0.000000e+00> : vector<8x8xf32>
    %61 = tpu.matmul %57, %60, %cst_25 {dimension_numbers = #tpu.dot_dimension_numbers<[1], [0], [0], [1], [0, 0, 1, 1], [], []>} : vector<8x8xf32>, vector<8x8xf32>, vector<8x8xf32> -> vector<8x8xf32>
    %cst_26 = arith.constant 0.353553385 : f32
    %62 = vector.broadcast %cst_26 : f32 to vector<8x8xf32>
    %63 = arith.mulf %61, %62 : vector<8x8xf32>
    %64 = vector.broadcast %7 : vector<1x8xf32> to vector<8x8xf32>
    %65 = arith.addf %63, %64 : vector<8x8xf32>
    %cst_27 = arith.constant dense<0xFF800000> : vector<8xf32>
    %66 = vector.multi_reduction <maximumf>, %65, %cst_27 [1] : vector<8x8xf32> to vector<8xf32>
    %67 = vector.shape_cast %66 : vector<8xf32> to vector<8x1xf32>
    %68 = vector.broadcast %67 : vector<8x1xf32> to vector<8x8xf32>
    %69 = arith.subf %65, %68 : vector<8x8xf32>
    %70 = math.exp %69 : vector<8x8xf32>
    %cst_28 = arith.constant dense<0.000000e+00> : vector<8xf32>
    %71 = vector.multi_reduction <add>, %70, %cst_28 [1] : vector<8x8xf32> to vector<8xf32>
    %72 = vector.shape_cast %71 : vector<8xf32> to vector<8x1xf32>
    %73 = tpu.reciprocal %72 {approx = true} : vector<8x1xf32> -> vector<8x1xf32>
    %74 = vector.broadcast %73 : vector<8x1xf32> to vector<8x8xf32>
    %75 = arith.mulf %70, %74 : vector<8x8xf32>
    %cst_29 = arith.constant dense<0.000000e+00> : vector<8x8xf32>
    %76 = tpu.matmul %75, %59, %cst_29 {dimension_numbers = #tpu.dot_dimension_numbers<[1], [0], [0], [1], [0, 0, 1, 1], [], []>} : vector<8x8xf32>, vector<8x8xf32>, vector<8x8xf32> -> vector<8x8xf32>
    %77 = vector.extract_strided_slice %36 {offsets = [0, 16], sizes = [8, 8], strides = [1, 1]} : vector<8x96xf32> to vector<8x8xf32>
    %78 = vector.extract_strided_slice %36 {offsets = [0, 48], sizes = [8, 8], strides = [1, 1]} : vector<8x96xf32> to vector<8x8xf32>
    %79 = vector.extract_strided_slice %36 {offsets = [0, 80], sizes = [8, 8], strides = [1, 1]} : vector<8x96xf32> to vector<8x8xf32>
    %80 = tpu.transpose %78, [1, 0] : vector<8x8xf32> -> vector<8x8xf32>
    %cst_30 = arith.constant dense<0.000000e+00> : vector<8x8xf32>
    %81 = tpu.matmul %77, %80, %cst_30 {dimension_numbers = #tpu.dot_dimension_numbers<[1], [0], [0], [1], [0, 0, 1, 1], [], []>} : vector<8x8xf32>, vector<8x8xf32>, vector<8x8xf32> -> vector<8x8xf32>
    %cst_31 = arith.constant 0.353553385 : f32
    %82 = vector.broadcast %cst_31 : f32 to vector<8x8xf32>
    %83 = arith.mulf %81, %82 : vector<8x8xf32>
    %84 = vector.broadcast %7 : vector<1x8xf32> to vector<8x8xf32>
    %85 = arith.addf %83, %84 : vector<8x8xf32>
    %cst_32 = arith.constant dense<0xFF800000> : vector<8xf32>
    %86 = vector.multi_reduction <maximumf>, %85, %cst_32 [1] : vector<8x8xf32> to vector<8xf32>
    %87 = vector.shape_cast %86 : vector<8xf32> to vector<8x1xf32>
    %88 = vector.broadcast %87 : vector<8x1xf32> to vector<8x8xf32>
    %89 = arith.subf %85, %88 : vector<8x8xf32>
    %90 = math.exp %89 : vector<8x8xf32>
    %cst_33 = arith.constant dense<0.000000e+00> : vector<8xf32>
    %91 = vector.multi_reduction <add>, %90, %cst_33 [1] : vector<8x8xf32> to vector<8xf32>
    %92 = vector.shape_cast %91 : vector<8xf32> to vector<8x1xf32>
    %93 = tpu.reciprocal %92 {approx = true} : vector<8x1xf32> -> vector<8x1xf32>
    %94 = vector.broadcast %93 : vector<8x1xf32> to vector<8x8xf32>
    %95 = arith.mulf %90, %94 : vector<8x8xf32>
    %cst_34 = arith.constant dense<0.000000e+00> : vector<8x8xf32>
    %96 = tpu.matmul %95, %79, %cst_34 {dimension_numbers = #tpu.dot_dimension_numbers<[1], [0], [0], [1], [0, 0, 1, 1], [], []>} : vector<8x8xf32>, vector<8x8xf32>, vector<8x8xf32> -> vector<8x8xf32>
    %97 = vector.extract_strided_slice %36 {offsets = [0, 24], sizes = [8, 8], strides = [1, 1]} : vector<8x96xf32> to vector<8x8xf32>
    %98 = vector.extract_strided_slice %36 {offsets = [0, 56], sizes = [8, 8], strides = [1, 1]} : vector<8x96xf32> to vector<8x8xf32>
    %99 = vector.extract_strided_slice %36 {offsets = [0, 88], sizes = [8, 8], strides = [1, 1]} : vector<8x96xf32> to vector<8x8xf32>
    %100 = tpu.transpose %98, [1, 0] : vector<8x8xf32> -> vector<8x8xf32>
    %cst_35 = arith.constant dense<0.000000e+00> : vector<8x8xf32>
    %101 = tpu.matmul %97, %100, %cst_35 {dimension_numbers = #tpu.dot_dimension_numbers<[1], [0], [0], [1], [0, 0, 1, 1], [], []>} : vector<8x8xf32>, vector<8x8xf32>, vector<8x8xf32> -> vector<8x8xf32>
    %cst_36 = arith.constant 0.353553385 : f32
    %102 = vector.broadcast %cst_36 : f32 to vector<8x8xf32>
    %103 = arith.mulf %101, %102 : vector<8x8xf32>
    %104 = vector.broadcast %7 : vector<1x8xf32> to vector<8x8xf32>
    %105 = arith.addf %103, %104 : vector<8x8xf32>
    %cst_37 = arith.constant dense<0xFF800000> : vector<8xf32>
    %106 = vector.multi_reduction <maximumf>, %105, %cst_37 [1] : vector<8x8xf32> to vector<8xf32>
    %107 = vector.shape_cast %106 : vector<8xf32> to vector<8x1xf32>
    %108 = vector.broadcast %107 : vector<8x1xf32> to vector<8x8xf32>
    %109 = arith.subf %105, %108 : vector<8x8xf32>
    %110 = math.exp %109 : vector<8x8xf32>
    %cst_38 = arith.constant dense<0.000000e+00> : vector<8xf32>
    %111 = vector.multi_reduction <add>, %110, %cst_38 [1] : vector<8x8xf32> to vector<8xf32>
    %112 = vector.shape_cast %111 : vector<8xf32> to vector<8x1xf32>
    %113 = tpu.reciprocal %112 {approx = true} : vector<8x1xf32> -> vector<8x1xf32>
    %114 = vector.broadcast %113 : vector<8x1xf32> to vector<8x8xf32>
    %115 = arith.mulf %110, %114 : vector<8x8xf32>
    %cst_39 = arith.constant dense<0.000000e+00> : vector<8x8xf32>
    %116 = tpu.matmul %115, %99, %cst_39 {dimension_numbers = #tpu.dot_dimension_numbers<[1], [0], [0], [1], [0, 0, 1, 1], [], []>} : vector<8x8xf32>, vector<8x8xf32>, vector<8x8xf32> -> vector<8x8xf32>
    %117 = tpu.concatenate %56, %76, %96, %116 in 1 : vector<8x8xf32>, vector<8x8xf32>, vector<8x8xf32>, vector<8x8xf32> -> vector<8x32xf32>
    %c0_40 = arith.constant 0 : index
    %c0_41 = arith.constant 0 : index
    %118 = vector.load %arg7[%c0_40, %c0_41] : memref<32x32xf32, #tpu.memory_space<vmem>>, vector<32x32xf32>
    %cst_42 = arith.constant dense<0.000000e+00> : vector<8x32xf32>
    %119 = tpu.matmul %117, %118, %cst_42 {dimension_numbers = #tpu.dot_dimension_numbers<[1], [0], [0], [1], [0, 0, 1, 1], [], []>} : vector<8x32xf32>, vector<32x32xf32>, vector<8x32xf32> -> vector<8x32xf32>
    %c0_43 = arith.constant 0 : index
    %c0_44 = arith.constant 0 : index
    %120 = vector.load %arg8[%c0_43, %c0_44] : memref<1x32xf32, #tpu.memory_space<vmem>>, vector<1x32xf32>
    %121 = vector.broadcast %120 : vector<1x32xf32> to vector<8x32xf32>
    %122 = arith.addf %119, %121 : vector<8x32xf32>
    %123 = arith.addf %1, %122 : vector<8x32xf32>
    %c0_45 = arith.constant 0 : index
    %c0_46 = arith.constant 0 : index
    %124 = vector.load %arg9[%c0_45, %c0_46] : memref<1x32xf32, #tpu.memory_space<vmem>>, vector<1x32xf32>
    %c0_47 = arith.constant 0 : index
    %c0_48 = arith.constant 0 : index
    %125 = vector.load %arg10[%c0_47, %c0_48] : memref<1x32xf32, #tpu.memory_space<vmem>>, vector<1x32xf32>
    %cst_49 = arith.constant dense<0.000000e+00> : vector<8xf32>
    %126 = vector.multi_reduction <add>, %123, %cst_49 [1] : vector<8x32xf32> to vector<8xf32>
    %127 = vector.shape_cast %126 : vector<8xf32> to vector<8x1xf32>
    %cst_50 = arith.constant 3.200000e+01 : f32
    %128 = vector.broadcast %cst_50 : f32 to vector<8x1xf32>
    %129 = arith.divf %127, %128 : vector<8x1xf32>
    %130 = vector.broadcast %129 : vector<8x1xf32> to vector<8x32xf32>
    %131 = arith.subf %123, %130 : vector<8x32xf32>
    %132 = arith.mulf %131, %131 : vector<8x32xf32>
    %cst_51 = arith.constant dense<0.000000e+00> : vector<8xf32>
    %133 = vector.multi_reduction <add>, %132, %cst_51 [1] : vector<8x32xf32> to vector<8xf32>
    %134 = vector.shape_cast %133 : vector<8xf32> to vector<8x1xf32>
    %cst_52 = arith.constant 0.0322580636 : f32
    %135 = vector.broadcast %cst_52 : f32 to vector<8x1xf32>
    %136 = arith.mulf %134, %135 : vector<8x1xf32>
    %137 = vector.broadcast %129 : vector<8x1xf32> to vector<8x32xf32>
    %138 = arith.subf %123, %137 : vector<8x32xf32>
    %cst_53 = arith.constant 9.99999997E-7 : f32
    %139 = vector.broadcast %cst_53 : f32 to vector<8x1xf32>
    %140 = arith.addf %136, %139 : vector<8x1xf32>
    %141 = math.rsqrt %140 : vector<8x1xf32>
    %142 = vector.broadcast %141 : vector<8x1xf32> to vector<8x32xf32>
    %143 = arith.mulf %138, %142 : vector<8x32xf32>
    %144 = vector.broadcast %124 : vector<1x32xf32> to vector<8x32xf32>
    %145 = arith.mulf %144, %143 : vector<8x32xf32>
    %146 = vector.broadcast %125 : vector<1x32xf32> to vector<8x32xf32>
    %147 = arith.addf %145, %146 : vector<8x32xf32>
    %c0_54 = arith.constant 0 : index
    %c0_55 = arith.constant 0 : index
    %148 = vector.load %arg11[%c0_54, %c0_55] : memref<32x64xf32, #tpu.memory_space<vmem>>, vector<32x64xf32>
    %cst_56 = arith.constant dense<0.000000e+00> : vector<8x64xf32>
    %149 = tpu.matmul %147, %148, %cst_56 {dimension_numbers = #tpu.dot_dimension_numbers<[1], [0], [0], [1], [0, 0, 1, 1], [], []>} : vector<8x32xf32>, vector<32x64xf32>, vector<8x64xf32> -> vector<8x64xf32>
    %c0_57 = arith.constant 0 : index
    %c0_58 = arith.constant 0 : index
    %150 = vector.load %arg12[%c0_57, %c0_58] : memref<1x64xf32, #tpu.memory_space<vmem>>, vector<1x64xf32>
    %151 = vector.broadcast %150 : vector<1x64xf32> to vector<8x64xf32>
    %152 = arith.addf %149, %151 : vector<8x64xf32>
    %cst_59 = arith.constant 0.000000e+00 : f32
    %153 = vector.broadcast %cst_59 : f32 to vector<8x64xf32>
    %154 = arith.maximumf %152, %153 : vector<8x64xf32>
    %c0_60 = arith.constant 0 : index
    %c0_61 = arith.constant 0 : index
    %155 = vector.load %arg13[%c0_60, %c0_61] : memref<64x32xf32, #tpu.memory_space<vmem>>, vector<64x32xf32>
    %cst_62 = arith.constant dense<0.000000e+00> : vector<8x32xf32>
    %156 = tpu.matmul %154, %155, %cst_62 {dimension_numbers = #tpu.dot_dimension_numbers<[1], [0], [0], [1], [0, 0, 1, 1], [], []>} : vector<8x64xf32>, vector<64x32xf32>, vector<8x32xf32> -> vector<8x32xf32>
    %c0_63 = arith.constant 0 : index
    %c0_64 = arith.constant 0 : index
    %157 = vector.load %arg14[%c0_63, %c0_64] : memref<1x32xf32, #tpu.memory_space<vmem>>, vector<1x32xf32>
    %158 = vector.broadcast %157 : vector<1x32xf32> to vector<8x32xf32>
    %159 = arith.addf %156, %158 : vector<8x32xf32>
    %160 = arith.addf %123, %159 : vector<8x32xf32>
    %c0_65 = arith.constant 0 : index
    %c0_66 = arith.constant 0 : index
    %c0_67 = arith.constant 0 : index
    %161 = vector.load %arg15[%c0_65, %c0_66, %c0_67] : memref<1x8x32xf32, #tpu.memory_space<vmem>>, vector<1x8x32xf32>
    %162 = vector.shape_cast %161 : vector<1x8x32xf32> to vector<8x32xf32>
    %163 = vector.shape_cast %160 : vector<8x32xf32> to vector<1x8x32xf32>
    tpu.vector_store %arg15[%c0_65, %c0_66, %c0_67], %163 {strides = array<i32>} : memref<1x8x32xf32, #tpu.memory_space<vmem>>, vector<1x8x32xf32>,
    return
  }
  func.func @transform_0(%arg0: i32) -> (i32, i32, i32) {
    %c0_i32 = arith.constant 0 : i32
    %c0_i32_0 = arith.constant 0 : i32
    %c0_i32_1 = arith.constant 0 : i32
    return %arg0, %c0_i32, %c0_i32_0 : i32, i32, i32
  }
  func.func @transform_1(%arg0: i32) -> (i32, i32, i32) {
    %c0_i32 = arith.constant 0 : i32
    %c0_i32_0 = arith.constant 0 : i32
    %c0_i32_1 = arith.constant 0 : i32
    return %arg0, %c0_i32, %c0_i32_0 : i32, i32, i32
  }
  func.func @transform_2(%arg0: i32) -> (i32, i32) {
    %c0_i32 = arith.constant 0 : i32
    %c0_i32_0 = arith.constant 0 : i32
    %c0_i32_1 = arith.constant 0 : i32
    return %c0_i32, %c0_i32_0 : i32, i32
  }
  func.func @transform_3(%arg0: i32) -> (i32, i32) {
    %c0_i32 = arith.constant 0 : i32
    %c0_i32_0 = arith.constant 0 : i32
    %c0_i32_1 = arith.constant 0 : i32
    return %c0_i32, %c0_i32_0 : i32, i32
  }
  func.func @transform_4(%arg0: i32) -> (i32, i32) {
    %c0_i32 = arith.constant 0 : i32
    %c0_i32_0 = arith.constant 0 : i32
    %c0_i32_1 = arith.constant 0 : i32
    return %c0_i32, %c0_i32_0 : i32, i32
  }
  func.func @transform_5(%arg0: i32) -> (i32, i32) {
    %c0_i32 = arith.constant 0 : i32
    %c0_i32_0 = arith.constant 0 : i32
    %c0_i32_1 = arith.constant 0 : i32
    return %c0_i32, %c0_i32_0 : i32, i32
  }
  func.func @transform_6(%arg0: i32) -> (i32, i32) {
    %c0_i32 = arith.constant 0 : i32
    %c0_i32_0 = arith.constant 0 : i32
    %c0_i32_1 = arith.constant 0 : i32
    return %c0_i32, %c0_i32_0 : i32, i32
  }
  func.func @transform_7(%arg0: i32) -> (i32, i32) {
    %c0_i32 = arith.constant 0 : i32
    %c0_i32_0 = arith.constant 0 : i32
    %c0_i32_1 = arith.constant 0 : i32
    return %c0_i32, %c0_i32_0 : i32, i32
  }
  func.func @transform_8(%arg0: i32) -> (i32, i32) {
    %c0_i32 = arith.constant 0 : i32
    %c0_i32_0 = arith.constant 0 : i32
    %c0_i32_1 = arith.constant 0 : i32
    return %c0_i32, %c0_i32_0 : i32, i32
  }
  func.func @transform_9(%arg0: i32) -> (i32, i32) {
    %c0_i32 = arith.constant 0 : i32
    %c0_i32_0 = arith.constant 0 : i32
    %c0_i32_1 = arith.constant 0 : i32
    return %c0_i32, %c0_i32_0 : i32, i32
  }
  func.func @transform_10(%arg0: i32) -> (i32, i32) {
    %c0_i32 = arith.constant 0 : i32
    %c0_i32_0 = arith.constant 0 : i32
    %c0_i32_1 = arith.constant 0 : i32
    return %c0_i32, %c0_i32_0 : i32, i32
  }
  func.func @transform_11(%arg0: i32) -> (i32, i32) {
    %c0_i32 = arith.constant 0 : i32
    %c0_i32_0 = arith.constant 0 : i32
    %c0_i32_1 = arith.constant 0 : i32
    return %c0_i32, %c0_i32_0 : i32, i32
  }
  func.func @transform_12(%arg0: i32) -> (i32, i32) {
    %c0_i32 = arith.constant 0 : i32
    %c0_i32_0 = arith.constant 0 : i32
    %c0_i32_1 = arith.constant 0 : i32
    return %c0_i32, %c0_i32_0 : i32, i32
  }
  func.func @transform_13(%arg0: i32) -> (i32, i32) {
    %c0_i32 = arith.constant 0 : i32
    %c0_i32_0 = arith.constant 0 : i32
    %c0_i32_1 = arith.constant 0 : i32
    return %c0_i32, %c0_i32_0 : i32, i32
  }
  func.func @transform_14(%arg0: i32) -> (i32, i32, i32) {
    %c0_i32 = arith.constant 0 : i32
    %c0_i32_0 = arith.constant 0 : i32
    %c0_i32_1 = arith.constant 0 : i32
    return %arg0, %c0_i32, %c0_i32_0 : i32, i32, i32
  }
}

</mosaic_0001>

<bundles_post_ra>
// kernel: tpu_custom_call.1
= control target key start
LH: loop header
LB: loop body
LE: loop exit
PB: predicated region body
PF: predicated region fallthrough
CT: control target
= control target key end

     0   :  { %s2508_s0 = inlined_call_operand.hbm [shape: f32[2,8,32], index: 0, kind: input, shape index: {}]   ;;  %s2509_s1 = inlined_call_operand.vmem [shape: f32[2,1,8], index: 1, kind: input, shape index: {}]   ;;  %s2510_s2 = inlined_call_operand.vmem [shape: f32[1,32], index: 2, kind: input, shape index: {}]   ;;  %s2511_s3 = inlined_call_operand.vmem [shape: f32[1,32], index: 3, kind: input, shape index: {}]   ;;  %s2512_s4 = inlined_call_operand.vmem [shape: f32[32,96], index: 4, kind: input, shape index: {}]   ;;  %s2513_s5 = inlined_call_operand.vmem [shape: f32[1,96], index: 5, kind: input, shape index: {}]   ;;  %s2514_s6 = inlined_call_operand.vmem [shape: f32[32,32], index: 6, kind: input, shape index: {}]   ;;  %s2515_s7 = inlined_call_operand.vmem [shape: f32[1,32], index: 7, kind: input, shape index: {}]   ;;  %s2516_s8 = inlined_call_operand.vmem [shape: f32[1,32], index: 8, kind: input, shape index: {}]   ;;  %s2517_s9 = inlined_call_operand.vmem [shape: f32[1,32], index: 9, kind: input, shape index: {}]   ;;  %s2518_s10 = inlined_call_operand.vmem [shape: f32[32,64], index: 10, kind: input, shape index: {}]   ;;  %s2519_s11 = inlined_call_operand.vmem [shape: f32[1,64], index: 11, kind: input, shape index: {}]   ;;  %s2520_s12 = inlined_call_operand.vmem [shape: f32[64,32], index: 12, kind: input, shape index: {}]   ;;  %s2521_s13 = inlined_call_operand.vmem [shape: f32[1,32], index: 13, kind: input, shape index: {}]   ;;  %s2522_s14 = inlined_call_operand.hbm [shape: f32[2,8,32], index: 14, kind: output, shape index: {}]  }
   0x1   :  { %2529 = sst [smem:[#allocation12_spill]] %s2522_s14 }
   0x2   :  { %19 = vsyncpa [#allocation3], 0 }
   0x3   :  { %21 = vsyncpa [#allocation3 + $0x1], 0 }
   0x4   :  { %22 = vsyncpa [#allocation4], 0 }
   0x5   :  { %24 = vsyncpa [#allocation4 + $0x1], 0  ;;  %s2164_s29 = smov 0   ;;  %s2166_s30 = smov 0  }
   0x6   :  { %s2168_s15 = smov 0   ;;  %s2170_s16 = smov 0  }
   0x7 LB: > { %2530 = sst [smem:[#allocation8_spill]] %s2056_s29  ;;  %s2185_s17 = sadd.s32 4294967295, %s2068_s16   ;;  %s2068_s16 = sphi %s2170_s16, %s2546_s16   ;;  %s2064_s15 = sphi %s2168_s15, %s2548_s15   ;;  %s2060_s30 = sphi %s2166_s30, %s2550_s30   ;;  %s2056_s29 = sphi %s2164_s29, %s2549_s29  }
   0x8   : > { %2531 = sst [smem:[#allocation9_spill]] %s2064_s15  ;;  %s1690_s18 = sadd.s32 4294967294, %s2068_s16  }
   0x9   : > { %s2189_s19 = sadd.s32 1, %s2068_s16   ;;  %s37_s20 = sadd.s32 1, %s2064_s15 }
   0xa   : > { %2532 = sst [smem:[#allocation10_spill]] %s2189_s19  ;;  %s34_s21 = ssub.s32 %s2068_s16, %s2189_s19 }
   0xb   : > { %p44_p0 = scmp.ne.s32.totalorder %s2064_s15, %s2060_s30  ;;  %p35_p1 = scmp.eq.s32.totalorder %s34_s21, 0 }
   0xc   : > { %p45_p2 = scmp.eq.s32.totalorder %s2068_s16, 0  ;;  %p50_p3 = scmp.ne.s32.totalorder %s2060_s30, %s2056_s29 }
   0xd   : > { %p51_p4 = scmp.eq.s32.totalorder %s2185_s17, 0  ;;  %p352_p7 = scmp.eq.s32.totalorder %s2185_s17, 1 }
   0xe   : > { %s2201_s22 = scalar_select %p35_p1, %s2064_s15, %s37_s20  }
   0xf   : > { %p2203_p5 = por %p45_p2, %p44_p0  ;;  %p2207_p6 = por %p51_p4, %p50_p3 }
  0x10   : > { %2533 = sst [smem:[#allocation11_spill]] %s2201_s22  ;;  %p358_p8 = scmp.eq.s32.totalorder %s1690_s18, 1 }
  0x11   : > { %p1901_p10 = scmp.lt.s32.totalorder %s2068_s16, 2  ;;  %p2214_p11 = por %p352_p7, %p44_p0 }
  0x12   : > { %p2218_p12 = por %p358_p8, %p50_p3  ;;  %s414_s27 = sand.u32 1, %s2064_s15  }
  0x13   : > { %s2536_s25 = scalar_select %p2214_p11, 1, 0 }
  0x14   : > { %s2537_s26 = scalar_select %p2218_p12, 1, 0 }
  0x15   : > { %s1694_s28 = sshll.u32 %s2068_s16, 7  ;;  %s1693_s20 = sshll.u32 %s414_s27, 3 }
  0x16   : > { %s2227_s19 = scalar_lea.hbm %s2508_s0, %s1694_s28  ;;  %s418_s18 = scalar_lea.vmem [#allocation2], %s1693_s20 }
  0x17   : > { %s425_s29 = sshll.u32 %s418_s18, 4  ;;  %p2231_p13 = pnand %p1901_p10, %p2203_p5  ;;  %s2235_s29 = int_to_ptr.vmem [resolvable:$true] %s425_s29 }
  0x18   : > { %s415_s22 = scalar_lea.sflag [#allocation3], %s414_s27  ;;  %s1972_s28 = scalar_lea.hbm %s2227_s19, 128 }
  0x19   : > { %p1973_p2 = scmp.ne.s32.totalorder %s2227_s19, %s1972_s28  ;;  %p1974_p3 = pneg %p2231_p13 }
  0x1a   : > { %s1977_s21 = scalar_lea.hbm %s2508_s0, 256  ;;  %p1978_p5 = scmp.lt.u32.totalorder %s2227_s19, %s2508_s0 }
  0x1b   : > { %p1975_p4 = pnand %p1974_p3, %p1973_p2  ;;  %p1979_p8 = scmp.lt.u32.totalorder %s1977_s21, %s1972_s28 }
  0x1c   : > { %p1981_p9 = scmp.lt.u32.totalorder %s1972_s28, %s2227_s19 }
  0x1d   : > { %p1976_p7 = pneg %p1975_p4  ;;  %p1980_p10 = por %p1979_p8, %p1978_p5 }
  0x1f   : > { %p1982_p0 = por %p1981_p9, %p1980_p10 }
  0x21   : > { %p1983_p1 = pnand %p1982_p0, %p1976_p7 }
  0x23   : > { %1986 = shalt.err (!%p1983_p1)
}
  0x24   : > { %s1987_s27 = scalar_lea.vmem %s2235_s29, 128  ;;  %s2070_s23 = smov [#allocation2]  }
  0x25   : > { %p1988_p2 = scmp.ne.s32.totalorder %s2235_s29, %s1987_s27  ;;  %s1992_s20 = sshll.u32 %s2070_s23, 4  ;;  %s1993_s20 = int_to_ptr.vmem [resolvable:$false] %s1992_s20 }
  0x26   : > { %s1994_s15 = scalar_lea.vmem %s1993_s20, 256  ;;  %p1995_p11 = scmp.lt.s32.totalorder %s2235_s29, %s1993_s20 }
  0x27   : > { %p1990_p4 = pnand %p1988_p2, %p1974_p3  ;;  %p1996_p5 = scmp.lt.s32.totalorder %s1994_s15, %s1987_s27 }
  0x29   : > { %p1991_p12 = pneg %p1990_p4  ;;  %p1997_p8 = por %p1996_p5, %p1995_p11 }
  0x2b   : > { %p1998_p9 = pnand %p1997_p8, %p1991_p12 }
  0x2d   : > { %2001 = shalt.err (!%p1998_p9)
}
  0x2e   : > { %1896 = dma.hbm_to_vmem [thread:$0]  (!%p2231_p13), %s2227_s19, 128, %s2235_s29, %s415_s22  }
  0x2f   : > { %p2539_p0 = scmp.lt.s32.totalorder %s2068_s16, 3  ;;  %p2540_p1 = scmp.ge.s32.totalorder %s2068_s16, 1 }
  0x31   : > { %p437_p3 = pnand %p2540_p1, %p2539_p0 }
  0x32   : > { %s2269_s28 = sand.u32 (!%p437_p3), 1, %s2060_s30  }
  0x33   : > { %440 = sbr.rel (%p437_p3) target bundleno = 2555 (0x9fb), region = 76  ;;  %s1696_s21 = sshll.u32 (!%p437_p3), %s2269_s28, 3 }
  0x34   : > { %s443_s18 = scalar_lea.sflag (!%p437_p3), [#allocation3], %s2269_s28  ;;  %s446_s14 = scalar_lea.vmem (!%p437_p3), [#allocation2], %s1696_s21 }
  0x3a   : > { %2047 = dma.done.wait (%p2207_p6), %s443_s18, 128  }
  0x3b   : > { %2049 = vsyncadd (%p2207_p6), %s443_s18, 4294967168  ;;  %vm503_vm0 = vcmask 261120   ;;  %v2279_v0 = vld [vmem:[%s446_s14] sm:$0xff]  ;;  %v534_v9 = vld [vmem:[%s2512_s4 + $0x10] sm:$0xff]  ;;  %v2071_v10 = vmov 0.0|0.0   ;;  %vm2072_vm1 = vmmov 0   ;;  %v696_v35 = vlaneseq }
  0x3c   : > { %v504_v1 = vsel %vm503_vm0, %v2279_v0, 0.0  ;;  %v532_v7 = vld [vmem:[%s2512_s4] sm:$0xff]  ;;  %v533_v8 = vld [vmem:[%s2512_s4 + $0x8] sm:$0xff]  ;;  %1859 = vmatprep.subr.bf16.mxu1 %v2071_v10  ;;  %v535_v12 = vld [vmem:[%s2512_s4 + $0x18] sm:$0xff]  ;;  %v2073_v13 = vmov 0.0   ;;  %s2074_s27 = smov 120  }
  0x3d   : > { %505 = vadd.xlane.f32.xlu0 %v504_v1  ;;  %v1860_v11 = vpack.c.bf16 %v533_v8, %v532_v7  ;;  %1775 = vmatprep.mubr.msk.f32.mxu1 %vm2072_vm1, %v2073_v13  ;;  %v1863_v14 = vpack.c.bf16 %v535_v12, %v534_v9  ;;  %v1699_v19 = vld [vmem:[%s2510_s2] ss:$0 sm:$0xff]  ;;  %s2075_s23 = smov 96   ;;  %s2076_s20 = smov 88   ;;  %vm619_vm2 = vcmask 64512   ;;  %v697_v38 = vshrl.u32 %v696_v35, 7 }
  0x3e   : > { %1788 = vmatprep.subr.mxu0 %v2073_v13  ;;  %1790 = vmatprep.mubr.msk.f32.mxu0 %vm2072_vm1, %v2073_v13  ;;  %v1700_v21 = vld [vmem:[%s2511_s3] ss:$0 sm:$0xff]  ;;  %s2077_s15 = smov 80   ;;  %s2078_s18 = smov 112   ;;  %vm1303_vm3 = vcmask 130048   ;;  %vm1305_vm4 = vcmask 195584  }
  0x3f   : > { %1861 = vmatpush3.bf16.msra.mxu1 %v1860_v11  ;;  %v1701_v24 = vld [vmem:[%s2513_s5] ss:$0 sm:$0xff]  ;;  %s2079_s14 = smov 72   ;;  %s2080_s29 = smov 104   ;;  %v698_v40 = vsub.s32 0, %v697_v38  ;;  %v1308_v38 = vld [vmem:[%s2514_s6 + $0x8] sm:$0xff] }
  0x40   : > { %1862 = vmatprep.subr.bf16.mxu1 %v2071_v10  ;;  %p494_p6 = scmp.lt.s32.totalorder %s2185_s17, 1  ;;  %vm1521_vm5 = vcmask 523264   ;;  %p2542_p12 = scmp.ne.s32.totalorder %s2536_s25, 0 }
  0x42   : > { %s495_s19 = scalar_select %p494_p6, %s2185_s17, 1 }
  0x43   : > { %1864 = vmatpush3.bf16.msra.mxu1 %v1863_v14 }
  0x44   : > { %1778 = vmatprep.subr.mxu1 %v2073_v13 }
  0xca   : > { %v506_v2 = vpop.xlane.xlu0 %505 }
  0xcb   : > { %v508_v3 = vmul.f32 0.03125, %v506_v2 }
  0xcd   : > { %v509_v4 = vsub.f32 %v2279_v0, %v508_v3 }
  0xcf   : > { %v510_v5 = vmul.f32 %v509_v4, %v509_v4 }
  0xd1   : > { %v511_v6 = vsel %vm503_vm0, %v510_v5, 0.0 }
  0xd2   : > { %512 = vadd.xlane.f32.xlu0 %v511_v6 }
 0x15f   : > { %v513_v15 = vpop.xlane.xlu0 %512 }
 0x160   : > { %v514_v16 = vmul.f32 0.032258064, %v513_v15 }
 0x162   : > { %v515_v17 = vadd.f32 1e-06, %v514_v16 }
 0x164   : > { %1952 = vrsqrt.f32 %v515_v17 }
 0x16e   : > { %v1953_v18 = vpop.eup %1952 }
 0x16f   : > { %v517_v20 = vmul.f32 %v1953_v18, %v509_v4 }
 0x171   : > { %v524_v22 = vmul.f32 %v1699_v19, %v517_v20 }
 0x173   : > { %v531_v23 = vadd.f32 %v1700_v21, %v524_v22 }
 0x175   : > { %1776 = vmatmul.mubr.msk.f32.vlgmr.msra.gmra.mrb[0].mxu1 %vm503_vm0, %v531_v23 }
 0x176   : > { %1780 = vmatprep.mubr.msk.f32.mxu1 %vm2072_vm1, %v2073_v13 }
 0x248   : > { %v612_v25 = vpop.f32.mrb[0].mxu1 }
 0x249   : > { %v2317_v26 = vadd.f32 %v1701_v24, %v612_v25  ;;  %v1777_v27 = vpop.f32.mrb[1].mxu1 }
 0x24b   : > { %789 = vrot.lane.b32.xlu0 %v2317_v26, %s2074_s27  ;;  %617 = vrot.lane.b32.xlu1 %v2317_v26, %s2075_s23  ;;  %s496_s27 = scalar_lea.vmem %s2509_s1, %s495_s19  ;;  %s2081_s23 = smov 64  }
 0x24c   : > { %v498_v36 = vld [vmem:[%s496_s27] sm:$0x1]  ;;  %s1724_s27 = sshll.u32 %s2185_s17, 7  ;;  %s1598_s19 = scalar_lea.sflag [#allocation4], %s2269_s28 }
 0x24d   : > { %v1698_v37 = vadd.f32 -1.0, %v498_v36 }
 0x24f   : > { %791 = vrot.lane.b32.xlu1 %v2317_v26, %s2076_s20  ;;  %v500_v39 = vmul.f32 1e+09, %v1698_v37  ;;  %s2082_s20 = smov 48   ;;  %v1307_v37 = vld [vmem:[%s2514_s6] sm:$0xff] }
 0x251   : > { %v699_v41 = vrot.slane %v500_v39, %v698_v40  ;;  %v1866_v39 = vpack.c.bf16 %v1308_v38, %v1307_v37 }
 0x253   : > { %958 = vrot.lane.b32.xlu1 %v2317_v26, %s2077_s15  ;;  %s2083_s15 = smov 40  }
 0x257   : > { %956 = vrot.lane.b32.xlu1 %v2317_v26, %s2078_s18  ;;  %s2084_s18 = smov 56  }
 0x25b   : > { %1125 = vrot.lane.b32.xlu1 %v2317_v26, %s2079_s14  ;;  %s2087_s14 = smov 24  }
 0x25f   : > { %1123 = vrot.lane.b32.xlu1 %v2317_v26, %s2080_s29 }
 0x2bd   : > { %v618_v28 = vpop.permute.xlu1 %617  ;;  %v790_v30 = vpop.permute.xlu0 %789 }
 0x2be   : > { %1779 = vmatpush3.xpose.msk.msra.mxu1 %vm619_vm2, %v618_v28 }
 0x2bf   : > { %1783 = vmatprep.subr.mxu1 %v2073_v13 }
 0x2c1   : > { %1781 = vmatmul.mubr.msk.f32.vlgmr.msra.gmra.mrb[2].mxu1 %vm619_vm2, %v2317_v26  ;;  %v792_v29 = vpop.permute.xlu1 %791 }
 0x2c2   : > { %1789 = vmatpush3.xpose.msk.msra.mxu0 %vm619_vm2, %v792_v29  ;;  %1785 = vmatprep.mubr.msk.f32.mxu1 %vm2072_vm1, %v2073_v13 }
 0x2c3   : > { %1798 = vmatprep.subr.mxu0 %v2073_v13 }
 0x2c5   : > { %1791 = vmatmul.mubr.msk.f32.vlgmr.msra.gmra.mrb[0].mxu0 %vm619_vm2, %v790_v30  ;;  %v959_v31 = vpop.permute.xlu1 %958 }
 0x2c6   : > { %1799 = vmatpush3.xpose.msk.msra.mxu0 %vm619_vm2, %v959_v31  ;;  %1800 = vmatprep.mubr.msk.f32.mxu0 %vm2072_vm1, %v2073_v13 }
 0x2c7   : > { %1808 = vmatprep.subr.mxu0 %v2073_v13 }
 0x2c9   : > { %v957_v32 = vpop.permute.xlu1 %956 }
 0x2ca   : > { %1801 = vmatmul.mubr.msk.f32.vlgmr.msra.gmra.mrb[2].mxu0 %vm619_vm2, %v957_v32 }
 0x2cb   : > { %1810 = vmatprep.mubr.msk.f32.mxu0 %vm2072_vm1, %v2073_v13 }
 0x2cd   : > { %v1126_v33 = vpop.permute.xlu1 %1125 }
 0x2ce   : > { %1809 = vmatpush3.xpose.msk.msra.mxu0 %vm619_vm2, %v1126_v33 }
 0x2cf   : > { %1865 = vmatprep.subr.bf16.mxu0 %v2071_v10 }
 0x2d1   : > { %v1124_v34 = vpop.permute.xlu1 %1123 }
 0x2d2   : > { %1811 = vmatmul.mubr.msk.f32.vlgmr.msra.gmra.mrb[4].mxu0 %vm619_vm2, %v1124_v34 }
 0x2d3   : > { %1826 = vmatprep.mubr.msk.f32.mxu0 %vm2072_vm1, %v2073_v13  ;;  %1867 = vmatpush3.bf16.msra.mxu0 %v1866_v39 }
 0x2d4   : > { %1868 = vmatprep.subr.bf16.mxu0 %v2071_v10 }
 0x394   : > { %v690_v42 = vpop.f32.mrb[2].mxu1 }
 0x395   : > { %v694_v43 = vmul.f32 0.35355338, %v690_v42  ;;  %v1782_v44 = vpop.f32.mrb[3].mxu1  ;;  %v1309_v42 = vld [vmem:[%s2514_s6 + $0x10] sm:$0xff] }
 0x397   : > { %v701_v45 = vadd.f32 %v699_v41, %v694_v43  ;;  %v1310_v43 = vld [vmem:[%s2514_s6 + $0x18] sm:$0xff] }
 0x398   : > { %v863_v46 = vpop.f32.mrb[0].mxu0  ;;  %v1869_v44 = vpack.c.bf16 %v1310_v43, %v1309_v42 }
 0x399   : > { %v867_v47 = vmul.f32 0.35355338, %v863_v46  ;;  %v1792_v48 = vpop.f32.mrb[1].mxu0  ;;  %v702_v49 = vsel %vm619_vm2, %v701_v45, -inf }
 0x39a   : > { %703 = vmax.xlane.f32.xlu1 %v702_v49  ;;  %1870 = vmatpush3.bf16.msra.mxu0 %v1869_v44 }
 0x39b   : > { %v868_v50 = vadd.f32 %v867_v47, %v699_v41  ;;  %1877 = vmatprep.subr.bf16.mxu0 %v2071_v10 }
 0x39d   : > { %v1030_v51 = vpop.f32.mrb[2].mxu0  ;;  %v869_v52 = vsel %vm619_vm2, %v868_v50, -inf }
 0x39e   : > { %v1034_v53 = vmul.f32 0.35355338, %v1030_v51  ;;  %870 = vmax.xlane.f32.xlu0 %v869_v52  ;;  %v1802_v54 = vpop.f32.mrb[3].mxu0 }
 0x3a0   : > { %v1035_v55 = vadd.f32 %v1034_v53, %v699_v41 }
 0x3a2   : > { %v1036_v56 = vsel %vm619_vm2, %v1035_v55, -inf }
 0x3a3   : > { %1037 = vmax.xlane.f32.xlu1 %v1036_v56 }
 0x3a5   : > { %v1197_v57 = vpop.f32.mrb[4].mxu0 }
 0x3a6   : > { %v1201_v58 = vmul.f32 0.35355338, %v1197_v57  ;;  %v1812_v59 = vpop.f32.mrb[5].mxu0  ;;  %v1715_v57 = vld [vmem:[%s2515_s7] ss:$0 sm:$0xff] }
 0x3a8   : > { %v1202_v60 = vadd.f32 %v1201_v58, %v699_v41 }
 0x3aa   : > { %v1203_v61 = vsel %vm619_vm2, %v1202_v60, -inf }
 0x3ab   : > { %1204 = vmax.xlane.f32.xlu0 %v1203_v61 }
 0x3b4   : > { %713 = vrot.lane.b32.xlu1 %v2317_v26, %s2081_s23  ;;  %s493_s23 = scalar_lea.vmem [#allocation5], %s1696_s21  ;;  %s2088_s21 = smov [#allocation5]  }
 0x3b5   : > { %s2006_s24 = sshll.u32 %s2088_s21, 4  ;;  %s2007_s24 = int_to_ptr.vmem [resolvable:$false] %s2006_s24 }
 0x3b6   : > { %s2008_s22 = scalar_lea.vmem %s2007_s24, 256 }
 0x427   : > { %v704_v62 = vpop.xlane.xlu1 %703 }
 0x428   : > { %v705_v63 = vsub.f32 %v701_v45, %v704_v62 }
 0x42a   : > { %v706_v1 = vmul.f32 1.442695, %v705_v63 }
 0x42b   : > { %v871_v2 = vpop.xlane.xlu0 %870 }
 0x42c   : > { %1954 = vpow2.f32 %v706_v1  ;;  %v872_v3 = vsub.f32 %v868_v50, %v871_v2 }
 0x42e   : > { %v873_v4 = vmul.f32 1.442695, %v872_v3 }
 0x430   : > { %1956 = vpow2.f32 %v873_v4  ;;  %v1038_v5 = vpop.xlane.xlu1 %1037 }
 0x431   : > { %v1039_v6 = vsub.f32 %v1035_v55, %v1038_v5  ;;  %v1422_v5 = vld [vmem:[%s2518_s10 + $0x8] sm:$0xff] }
 0x433   : > { %v1040_v7 = vmul.f32 1.442695, %v1039_v6 }
 0x434   : > { %v714_v8 = vpop.permute.xlu1 %713 }
 0x435   : > { %1958 = vpow2.f32 %v1040_v7  ;;  %1784 = vmatpush3.msra.mxu1 %v714_v8  ;;  %v1424_v7 = vld [vmem:[%s2518_s10 + $0x18] sm:$0xff] }
 0x436   : > { %v1955_v9 = vpop.eup %1954  ;;  %1793 = vmatprep.subr.mxu1 %v2073_v13 }
 0x437   : > { %v708_v11 = vsel %vm619_vm2, %v1955_v9, 0.0 }
 0x438   : > { %v1205_v12 = vpop.xlane.xlu0 %1204  ;;  %709 = vadd.xlane.f32.xlu1 %v708_v11  ;;  %v1507_v11 = vld [vmem:[%s2520_s12 + $0x8] sm:$0xff] }
 0x439   : > { %v1206_v14 = vsub.f32 %v1202_v60, %v1205_v12  ;;  %v1508_v12 = vld [vmem:[%s2520_s12 + $0x10] sm:$0xff] }
 0x43a   : > { %v1957_v15 = vpop.eup %1956 }
 0x43b   : > { %v1207_v16 = vmul.f32 1.442695, %v1206_v14  ;;  %v875_v17 = vsel %vm619_vm2, %v1957_v15, 0.0 }
 0x43c   : > { %876 = vadd.xlane.f32.xlu0 %v875_v17  ;;  %v1510_v17 = vld [vmem:[%s2520_s12 + $0x20] sm:$0xff] }
 0x43d   : > { %1960 = vpow2.f32 %v1207_v16 }
 0x43f   : > { %v1959_v18 = vpop.eup %1958 }
 0x440   : > { %v1042_v19 = vsel %vm619_vm2, %v1959_v18, 0.0 }
 0x441   : > { %1043 = vadd.xlane.f32.xlu1 %v1042_v19 }
 0x447   : > { %v1961_v20 = vpop.eup %1960 }
 0x448   : > { %v1209_v21 = vsel %vm619_vm2, %v1961_v20, 0.0 }
 0x449   : > { %1210 = vadd.xlane.f32.xlu0 %v1209_v21 }
 0x452   : > { %1047 = vrot.lane.b32.xlu1 %v2317_v26, %s2082_s20  ;;  %s1611_s20 = sshll.u32 %s493_s23, 4  ;;  %s2465_s20 = int_to_ptr.vmem [resolvable:$true] %s1611_s20 }
 0x453   : > { %s2002_s17 = scalar_lea.vmem %s2465_s20, 128  ;;  %p2009_p10 = scmp.lt.s32.totalorder %s2465_s20, %s2007_s24 }
 0x454   : > { %p2003_p11 = scmp.ne.s32.totalorder %s2465_s20, %s2002_s17  ;;  %p2010_p2 = scmp.lt.s32.totalorder %s2008_s22, %s2002_s17 }
 0x456   : > { %1214 = vrot.lane.b32.xlu1 %v2317_v26, %s2083_s15  ;;  %s2085_s15 = smov 8   ;;  %p2004_p13 = pnand %p2003_p11, %p2542_p12 }
 0x457   : > { %p2011_p4 = por %p2010_p2, %p2009_p10 }
 0x458   : > { %p2005_p7 = pneg %p2004_p13 }
 0x45a   : > { %p2012_p5 = pnand %p2011_p4, %p2005_p7 }
 0x45f   : > { %880 = vrot.lane.b32.xlu0 %v2317_v26, %s2084_s18  ;;  %s2086_s18 = smov 16  }
 0x4c5   : > { %v710_v22 = vpop.xlane.xlu1 %709 }
 0x4c6   : > { %1962 = vrcp.f32 %v710_v22 }
 0x4c9   : > { %v877_v23 = vpop.xlane.xlu0 %876 }
 0x4ca   : > { %1964 = vrcp.f32 %v877_v23 }
 0x4ce   : > { %v1044_v24 = vpop.xlane.xlu1 %1043 }
 0x4cf   : > { %1966 = vrcp.f32 %v1044_v24  ;;  %v1717_v24 = vld [vmem:[%s2516_s8] ss:$0 sm:$0xff] }
 0x4d0   : > { %v1963_v25 = vpop.eup %1962 }
 0x4d1   : > { %v712_v27 = vmul.f32 %v1963_v25, %v1955_v9  ;;  %v1506_v9 = vld [vmem:[%s2520_s12] sm:$0xff] }
 0x4d2   : > { %v1048_v31 = vpop.permute.xlu1 %1047  ;;  %v1878_v14 = vpack.c.bf16 %v1507_v11, %v1506_v9 }
 0x4d3   : > { %1786 = vmatmul.mubr.msk.f32.vlgmr.msra.gmra.mrb[4].mxu1 %vm619_vm2, %v712_v27  ;;  %v1718_v27 = vld [vmem:[%s2517_s9] ss:$0 sm:$0xff] }
 0x4d4   : > { %1795 = vmatprep.mubr.msk.f32.mxu1 %vm2072_vm1, %v2073_v13  ;;  %v1965_v29 = vpop.eup %1964 }
 0x4d5   : > { %v879_v30 = vmul.f32 %v1965_v29, %v1957_v15  ;;  %v1509_v15 = vld [vmem:[%s2520_s12 + $0x18] sm:$0xff] }
 0x4d6   : > { %v1211_v28 = vpop.xlane.xlu0 %1210  ;;  %v1215_v34 = vpop.permute.xlu1 %1214  ;;  %v1881_v16 = vpack.c.bf16 %v1509_v15, %v1508_v12 }
 0x4d7   : > { %1968 = vrcp.f32 %v1211_v28 }
 0x4d9   : > { %v1967_v26 = vpop.eup %1966 }
 0x4da   : > { %v881_v32 = vpop.permute.xlu0 %880  ;;  %v1046_v33 = vmul.f32 %v1967_v26, %v1959_v18  ;;  %v1511_v18 = vld [vmem:[%s2520_s12 + $0x28] sm:$0xff] }
 0x4db   : > { %1794 = vmatpush3.msra.mxu1 %v881_v32  ;;  %v1884_v19 = vpack.c.bf16 %v1511_v18, %v1510_v17  ;;  %v1719_v32 = vld [vmem:[%s2519_s11] ss:$0 sm:$0xff] }
 0x4dc   : > { %1796 = vmatmul.mubr.msk.f32.vlgmr.msra.gmra.mrb[6].mxu1 %vm619_vm2, %v879_v30  ;;  %1803 = vmatprep.subr.mxu1 %v2073_v13  ;;  %v1513_v30 = vld [vmem:[%s2520_s12 + $0x38] sm:$0xff] }
 0x4dd   : > { %1804 = vmatpush3.msra.mxu1 %v1048_v31  ;;  %1805 = vmatprep.mubr.msk.f32.mxu1 %vm2072_vm1, %v2073_v13 }
 0x4de   : > { %1813 = vmatprep.subr.mxu1 %v2073_v13 }
 0x4e0   : > { %1806 = vmatmul.mubr.msk.f32.vlgmr.msra.gmra.mrb[8].mxu1 %vm619_vm2, %v1046_v33 }
 0x4e1   : > { %v1969_v35 = vpop.eup %1968  ;;  %1814 = vmatpush3.msra.mxu1 %v1215_v34  ;;  %1815 = vmatprep.mubr.msk.f32.mxu1 %vm2072_vm1, %v2073_v13 }
 0x4e2   : > { %v1213_v36 = vmul.f32 %v1969_v35, %v1961_v20  ;;  %1871 = vmatprep.subr.bf16.mxu1 %v2071_v10 }
 0x4e4   : > { %1816 = vmatmul.mubr.msk.f32.vlgmr.msra.gmra.mrb[10].mxu1 %vm619_vm2, %v1213_v36  ;;  %v1721_v36 = vld [vmem:[%s2521_s13] ss:$0 sm:$0xff] }
 0x4e5   : > { %1837 = vmatprep.mubr.msk.f32.mxu1 %vm2072_vm1, %v2073_v13 }
 0x5a6   : > { %v785_v40 = vpop.f32.mrb[4].mxu1 }
 0x5a7   : > { %v1787_v41 = vpop.f32.mrb[5].mxu1 }
 0x5af   : > { %v952_v45 = vpop.f32.mrb[6].mxu1 }
 0x5b0   : > { %1291 = vrot.lane.b32.xlu0 %v952_v45, %s2085_s15  ;;  %v1797_v46 = vpop.f32.mrb[7].mxu1 }
 0x5b3   : > { %v1119_v47 = vpop.f32.mrb[8].mxu1 }
 0x5b4   : > { %1295 = vrot.lane.b32.xlu1 %v1119_v47, %s2086_s18  ;;  %v1807_v48 = vpop.f32.mrb[9].mxu1 }
 0x5b7   : > { %v1286_v49 = vpop.f32.mrb[10].mxu1 }
 0x5b8   : > { %1299 = vrot.lane.b32.xlu0 %v1286_v49, %s2087_s14  ;;  %v1817_v50 = vpop.f32.mrb[11].mxu1  ;;  %s2541_s14 = sld [smem:[#allocation12_spill]] }
 0x5be   : > { %s2463_s29 = scalar_lea.hbm %s2541_s14, %s1724_s27 }
 0x622   : > { %v1292_v51 = vpop.permute.xlu0 %1291 }
 0x623   : > { %v1302_v53 = vsel %vm619_vm2, %v785_v40, %v1292_v51 }
 0x626   : > { %v1296_v52 = vpop.permute.xlu1 %1295 }
 0x627   : > { %v1304_v54 = vsel %vm1303_vm3, %v1302_v53, %v1296_v52 }
 0x62a   : > { %v1300_v55 = vpop.permute.xlu0 %1299 }
 0x62b   : > { %v1306_v56 = vsel %vm1305_vm4, %v1304_v54, %v1300_v55 }
 0x62c   : > { %1827 = vmatmul.mubr.msk.f32.vlgmr.msra.gmra.mrb[6].mxu0 %vm503_vm0, %v1306_v56 }
 0x62d   : > { %1856 = vmatprep.mubr.msk.f32.mxu0 %vm2072_vm1, %v2073_v13  ;;  %v1421_v13 = vld [vmem:[%s2518_s10] sm:$0xff]  ;;  %1879 = vmatpush3.bf16.msra.mxu0 %v1878_v14 }
 0x62e   : > { %v1872_v6 = vpack.c.bf16 %v1422_v5, %v1421_v13  ;;  %1880 = vmatprep.subr.bf16.mxu0 %v2071_v10 }
 0x630   : > { %1873 = vmatpush3.bf16.msra.mxu1 %v1872_v6 }
 0x631   : > { %1874 = vmatprep.subr.bf16.mxu1 %v2071_v10  ;;  %1882 = vmatpush3.bf16.msra.mxu0 %v1881_v16 }
 0x632   : > { %1883 = vmatprep.subr.bf16.mxu0 %v2071_v10 }
 0x635   : > { %1885 = vmatpush3.bf16.msra.mxu0 %v1884_v19 }
 0x636   : > { %1886 = vmatprep.subr.bf16.mxu0 %v2071_v10  ;;  %v1512_v10 = vld [vmem:[%s2520_s12 + $0x30] sm:$0xff] }
 0x637   : > { %v1887_v31 = vpack.c.bf16 %v1513_v30, %v1512_v10 }
 0x639   : > { %1888 = vmatpush3.bf16.msra.mxu0 %v1887_v31 }
 0x6ff   : > { %v1387_v58 = vpop.f32.mrb[6].mxu0 }
 0x700   : > { %v1388_v59 = vadd.f32 %v1715_v57, %v1387_v58  ;;  %v1828_v60 = vpop.f32.mrb[7].mxu0 }
 0x702   : > { %v1391_v61 = vadd.f32 %v1388_v59, %v2279_v0  ;;  %v1423_v0 = vld [vmem:[%s2518_s10 + $0x10] sm:$0xff] }
 0x703   : > { %v1875_v8 = vpack.c.bf16 %v1424_v7, %v1423_v0 }
 0x704   : > { %v1394_v62 = vsel %vm503_vm0, %v1391_v61, 0.0 }
 0x705   : > { %1395 = vadd.xlane.f32.xlu1 %v1394_v62  ;;  %1876 = vmatpush3.bf16.msra.mxu1 %v1875_v8 }
 0x792   : > { %v1396_v63 = vpop.xlane.xlu1 %1395 }
 0x793   : > { %v1397_v1 = vmul.f32 0.03125, %v1396_v63 }
 0x795   : > { %v1398_v2 = vsub.f32 %v1391_v61, %v1397_v1 }
 0x797   : > { %v1399_v3 = vmul.f32 %v1398_v2, %v1398_v2 }
 0x799   : > { %v1400_v4 = vsel %vm503_vm0, %v1399_v3, 0.0 }
 0x79a   : > { %1401 = vadd.xlane.f32.xlu0 %v1400_v4 }
 0x827   : > { %v1402_v20 = vpop.xlane.xlu0 %1401 }
 0x828   : > { %v1403_v21 = vmul.f32 0.032258064, %v1402_v20 }
 0x82a   : > { %v1404_v22 = vadd.f32 1e-06, %v1403_v21 }
 0x82c   : > { %1970 = vrsqrt.f32 %v1404_v22 }
 0x836   : > { %v1971_v23 = vpop.eup %1970 }
 0x837   : > { %v1406_v25 = vmul.f32 %v1971_v23, %v1398_v2 }
 0x839   : > { %v1413_v28 = vmul.f32 %v1717_v24, %v1406_v25 }
 0x83b   : > { %v1420_v29 = vadd.f32 %v1718_v27, %v1413_v28 }
 0x83d   : > { %1838 = vmatmul.mubr.msk.f32.vlgmr.msra.gmra.mrb[12].mxu1 %vm503_vm0, %v1420_v29 }
 0x910   : > { %v1501_v26 = vpop.f32.mrb[12].mxu1 }
 0x911   : > { %v1502_v33 = vadd.f32 %v1719_v32, %v1501_v26  ;;  %v1839_v34 = vpop.f32.mrb[13].mxu1 }
 0x913   : > { %v1505_v35 = vmax.f32 %v1502_v33, 0.0 }
 0x915   : > { %1857 = vmatmul.mubr.msk.f32.vlgmr.msra.gmra.mrb[8].mxu0 %vm1521_vm5, %v1505_v35 }
 0x9e8   : > { %v1591_v37 = vpop.f32.mrb[8].mxu0 }
 0x9e9   : > { %v1592_v38 = vadd.f32 %v1721_v36, %v1591_v37  ;;  %v1858_v39 = vpop.f32.mrb[9].mxu0 }
 0x9eb   : > { %v1595_v40 = vadd.f32 %v1592_v38, %v1391_v61 }
 0x9ed   : > { %1596 = vst.msk [vmem:[%s493_s23] sm:$0xff] %vm503_vm0, %v1595_v40 }
 0x9ee   : > { %2015 = shalt.err (!%p2012_p5)
}
 0x9ef   : > { %s2016_s28 = scalar_lea.hbm %s2463_s29, 128  ;;  %s2020_s15 = scalar_lea.hbm %s2541_s14, 256 }
 0x9f0   : > { %p2017_p8 = scmp.ne.s32.totalorder %s2463_s29, %s2016_s28  ;;  %p2021_p1 = scmp.lt.u32.totalorder %s2463_s29, %s2541_s14 }
 0x9f1   : > { %p2022_p3 = scmp.lt.u32.totalorder %s2020_s15, %s2016_s28  ;;  %p2024_p11 = scmp.lt.u32.totalorder %s2016_s28, %s2463_s29 }
 0x9f2   : > { %p2018_p9 = pnand %p2017_p8, %p2542_p12 }
 0x9f3   : > { %p2023_p6 = por %p2022_p3, %p2021_p1 }
 0x9f4   : > { %p2019_p0 = pneg %p2018_p9 }
 0x9f5   : > { %p2025_p13 = por %p2024_p11, %p2023_p6 }
 0x9f7   : > { %p2026_p7 = pnand %p2025_p13, %p2019_p0 }
 0x9f9   : > { %2029 = shalt.err (!%p2026_p7)
}
 0x9fa   : > { %1891 = dma.vmem_to_hbm [thread:$0]  (%p2542_p12), %s2465_s20, 128, %s2463_s29, %s1598_s19  }
 0x9fb PF: > { %s2543_s17 = sld [smem:[#allocation8_spill]]  ;;  %p2544_p10 = scmp.ne.s32.totalorder %s2537_s26, 0 }
 0x9fc   : > { %p2545_p2 = scmp.ge.s32.totalorder %s2068_s16, 2 }
 0x9fe   : > { %p1898_p4 = pnand %p2545_p2, %p2544_p10 }
 0xa01   : > { %s1623_s24 = sand.u32 1, %s2543_s17  }
 0xa02   : > { %s1624_s22 = scalar_lea.sflag [#allocation4], %s1623_s24 }
 0xa03   : > { %2051 = dma.done.wait (!%p1898_p4), %s1624_s22, 128  }
 0xa04   : > { %2053 = vsyncadd (!%p1898_p4), %s1624_s22, 4294967168  ;;  %s2546_s16 = sld [smem:[#allocation10_spill]]  ;;  %s2547_s28 = sld [smem:[#allocation9_spill]] }
 0xa05   : > { %s2548_s15 = sld [smem:[#allocation11_spill]]  ;;  %s2549_s29 = smov %s2060_s30 }
 0xa0a   : > { %p27_p5 = scmp.ge.s32.totalorder %s2546_s16, 4   ;;  %s2550_s30 = smov %s2547_s28 }
 0xa0c   :  { %29 = sbr.rel (!%p27_p5) target bundleno = 7 (0x7), region = 124 }
 0xa13   :  { %1629 = vsyncpa [#allocation3], 1 }
 0xa14   :  { %1631 = vsyncpa [#allocation3 + $0x1], 1 }
 0xa15   :  { %1632 = vsyncpa [#allocation4], 1 }
 0xa16   :  { %1634 = vsyncpa [#allocation4 + $0x1], 1 }

</bundles_post_ra>
